<compile_context>
chip_gen: v6e
topology: v6e:2x2x1
jax: 0.10.0
libtpu: 0.0.40
codegen_flags: <defaults>
</compile_context>

<pallas_src>
import functools

import jax
import jax.numpy as jnp
from jax.experimental import pallas as pl
from jax.experimental.pallas import tpu as pltpu

GAMMA = 2          # hardcoded as om*om in the kernel
EPS = 1e-10
LANES = 128


def _cdiv(a, b):
    return -(-a // b)


def _round_up(a, b):
    return _cdiv(a, b) * b


def _sublane_multiple(dtype) -> int:
    """Minimum sublane tile for a dtype: f32->8, bf16->16, int8/bool->32."""
    itemsize = jnp.dtype(dtype).itemsize
    return max(8, 32 // max(1, itemsize))


def _tiling_for_device():
    """(row_tile, preferred n_outer) per TPU generation."""
    try:
        kind = jax.devices()[0].device_kind.lower()
    except Exception:
        kind = ""
    if "v7" in kind or "tpu7" in kind:
        # 2 TensorCores/chip; 8192*128*4B = 4 MiB/input/step, 16 MiB
        # double-buffered -> fits the 32 MiB scoped-VMEM default.
        return 8192, 2
    if "v6" in kind or "trillium" in kind:
        return 8192, 1
    # v5e / older / unknown: 16 MiB scoped-VMEM default -> 8 MiB double-buffered.
    return 4096, 1


def _focal_sum_kernel(pred_ref, targ_ref, out_ref, *,
                      n_inner, n_tiles, valid_rows_last, row_tile):
    i = pl.program_id(0)
    j = pl.program_id(1)
    k = i * n_inner + j            # linear row-tile index

    # Resident accumulator block: zero once per outer block.
    @pl.when(j == 0)
    def _():
        out_ref[...] = jnp.zeros_like(out_ref)

    # Cast after load: HBM traffic stays in the native input dtypes.
    p = pred_ref[...].astype(jnp.float32)
    t = targ_ref[...].astype(jnp.float32)

    def _partial_sum(mask):
        # x[targ==1]=pred ; x[targ==0]=1-pred ; else 0
        x = jnp.where(t == 1.0, p, jnp.where(t == 0.0, 1.0 - p, jnp.zeros_like(p)))
        # x[x < eps] += eps
        x = jnp.where(x < EPS, x + EPS, x)
        if mask is not None:
            # Overhang rows of the partial last block -> x=1 -> contributes 0.
            x = jnp.where(mask, x, 1.0)
        om = 1.0 - x
        elem = (om * om) * jnp.log(x)          # gamma == 2
        # Fold the row tile to (8, LANES): pure VPU vreg adds, no cross-lane
        # reduce in the hot loop (that happens once in the wrapper).
        return elem.reshape(row_tile // 8, 8, LANES).sum(axis=0)

    # Hot path: all full tiles, no masking.
    @pl.when(k < n_tiles - 1)
    def _():
        out_ref[0] += _partial_sum(None)

    # Last tile only: mask the (possibly) partial block's garbage rows.
    @pl.when(k == n_tiles - 1)
    def _():
        row_idx = jax.lax.broadcasted_iota(jnp.int32, (row_tile, LANES), 0)
        out_ref[0] += _partial_sum(row_idx < valid_rows_last)
    # k > n_tiles - 1 (only possible for the odd-split tail on v7x): no-op,
    # the clamped index_map just re-fetches the last tile, contribution skipped.


def focal_loss(pred: jax.Array, targ: jax.Array) -> jax.Array:
    """Pallas implementation of FocalLoss.forward for NC... (e.g. NCHW) inputs.

    pred/targ may be any dtypes (e.g. bf16 pred, int8/bool targ) to cut HBM
    traffic; math is done in f32 inside the kernel.
    """
    assert pred.shape == targ.shape
    assert pred.ndim >= 2, "need a channel axis at dim 1 for sum(dim=1).mean()"
    C = pred.shape[1]
    numel = pred.size
    divisor = numel // C                   # sum(dim=1).mean() == sum_all / (numel/C)

    pred_flat = pred.reshape(-1)
    targ_flat = targ.reshape(-1)

    # Pad only to the next (sublane*128)-element boundary (< 4 KiB, usually 0)
    # so the 2-D view is layout-legal for every dtype.  (pred=1, targ=1)
    # contributes exactly 0, so this pad needs no in-kernel masking.
    sm = max(_sublane_multiple(pred.dtype), _sublane_multiple(targ.dtype))
    pad = (-numel) % (sm * LANES)
    if pad:
        pred_flat = jnp.pad(pred_flat, (0, pad), constant_values=1)
        targ_flat = jnp.pad(targ_flat, (0, pad), constant_values=1)
    rows = (numel + pad) // LANES          # multiple of sm

    row_tile_max, n_outer_pref = _tiling_for_device()
    row_tile = min(row_tile_max, rows)     # multiple of sm, never exceeds array
    n_tiles = _cdiv(rows, row_tile)        # last tile may be partial -> masked
    n_outer = max(1, min(n_outer_pref, n_tiles))
    n_inner = _cdiv(n_tiles, n_outer)
    valid_rows_last = rows - (n_tiles - 1) * row_tile

    pred2d = pred_flat.reshape(rows, LANES)
    targ2d = targ_flat.reshape(rows, LANES)

    if n_outer * n_inner == n_tiles:
        in_map = lambda i, j: (i * n_inner + j, 0)
    else:
        # Odd split on v7x: clamp the (at most one) excess grid cell's DMA;
        # its contribution is skipped in-kernel.
        in_map = lambda i, j: (jnp.minimum(i * n_inner + j, n_tiles - 1), 0)

    kernel = functools.partial(
        _focal_sum_kernel,
        n_inner=n_inner,
        n_tiles=n_tiles,
        valid_rows_last=valid_rows_last,
        row_tile=row_tile,
    )

    partials = pl.pallas_call(
        kernel,
        out_shape=jax.ShapeDtypeStruct((n_outer, 8, LANES), jnp.float32),
        grid=(n_outer, n_inner),
        in_specs=[
            pl.BlockSpec((row_tile, LANES), in_map),
            pl.BlockSpec((row_tile, LANES), in_map),
        ],
        out_specs=pl.BlockSpec((1, 8, LANES), lambda i, j: (i, 0, 0)),
        compiler_params=pltpu.CompilerParams(
            dimension_semantics=("parallel", "arbitrary")),
    )(pred2d, targ2d)

    total = jnp.sum(partials)              # one small cross-lane reduce in XLA
    return -total / jnp.float32(divisor)


def focal_loss_ref(pred, targ):
    """Pure-JAX reference mirroring the PyTorch forward."""
    p = pred.astype(jnp.float32)
    t = targ.astype(jnp.float32)
    x = jnp.where(t == 1.0, p, jnp.where(t == 0.0, 1.0 - p, jnp.zeros_like(p)))
    x = jnp.where(x < EPS, x + EPS, x)
    per = (1.0 - x) ** GAMMA * jnp.log(x)
    return -(per.sum(axis=1).mean())


if __name__ == "__main__":
    key = jax.random.PRNGKey(0)
    k1, k2 = jax.random.split(key)
    B, C, H, W = 2, 4, 16, 16
    # pred: probabilities in (0,1); targ: binary {0,1}
    pred = jax.nn.sigmoid(jax.random.normal(k1, (B, C, H, W), dtype=jnp.float32))
    targ = (jax.random.uniform(k2, (B, C, H, W)) > 0.5).astype(jnp.float32)

    out = focal_loss(pred, targ)
    jax.block_until_ready(out)

    ref = focal_loss_ref(pred, targ)
    assert jnp.allclose(out, ref, rtol=1e-5, atol=1e-5), (out, ref)
    print("KERNEL_OK")
</pallas_src>

<mosaic_0001>
module attributes {stable_mosaic.version = 11 : i64} {
  func.func @_focal_sum_kernel(%arg0: i32, %arg1: i32, %arg2: memref<16x128xf32, #tpu.memory_space<vmem>>, %arg3: memref<16x128xf32, #tpu.memory_space<vmem>>, %arg4: memref<1x8x128xf32, #tpu.memory_space<vmem>>) attributes {dimension_semantics = [#tpu.dimension_semantics<parallel>, #tpu.dimension_semantics<arbitrary>], iteration_bounds = array<i64: 1, 1>, scalar_prefetch = 0 : i64, scratch_operands = 0 : i64, tpu.core_type = #tpu.core_type<tc>, window_params = [{transform_indices = @transform_0, window_bounds = array<i64: 16, 128>}, {transform_indices = @transform_1, window_bounds = array<i64: 16, 128>}, {transform_indices = @transform_2, window_bounds = array<i64: 1, 8, 128>}]} {
    %c1_i32 = arith.constant 1 : i32
    %0 = arith.muli %arg0, %c1_i32 : i32
    %1 = arith.addi %0, %arg1 : i32
    %c0_i32 = arith.constant 0 : i32
    %2 = arith.cmpi eq, %arg1, %c0_i32 : i32
    %3 = arith.extui %2 : i1 to i32
    %c0_i32_0 = arith.constant 0 : i32
    %4 = arith.cmpi ne, %3, %c0_i32_0 : i32
    scf.if %4 {
      %cst = arith.constant 0.000000e+00 : f32
      %13 = vector.broadcast %cst : f32 to vector<1x8x128xf32>
      %c0_8 = arith.constant 0 : index
      %c0_9 = arith.constant 0 : index
      %c0_10 = arith.constant 0 : index
      %14 = vector.load %arg4[%c0_8, %c0_9, %c0_10] : memref<1x8x128xf32, #tpu.memory_space<vmem>>, vector<1x8x128xf32>
      tpu.vector_store %arg4[%c0_8, %c0_9, %c0_10], %13 {strides = array<i32>} : memref<1x8x128xf32, #tpu.memory_space<vmem>>, vector<1x8x128xf32>,
    } else {
    }
    %c0 = arith.constant 0 : index
    %c0_1 = arith.constant 0 : index
    %5 = vector.load %arg2[%c0, %c0_1] : memref<16x128xf32, #tpu.memory_space<vmem>>, vector<16x128xf32>
    %c0_2 = arith.constant 0 : index
    %c0_3 = arith.constant 0 : index
    %6 = vector.load %arg3[%c0_2, %c0_3] : memref<16x128xf32, #tpu.memory_space<vmem>>, vector<16x128xf32>
    %c0_i32_4 = arith.constant 0 : i32
    %7 = arith.cmpi slt, %1, %c0_i32_4 : i32
    %8 = arith.extui %7 : i1 to i32
    %c0_i32_5 = arith.constant 0 : i32
    %9 = arith.cmpi ne, %8, %c0_i32_5 : i32
    scf.if %9 {
      %c0_8 = arith.constant 0 : index
      %c0_9 = arith.constant 0 : index
      %c0_10 = arith.constant 0 : index
      %13 = vector.load %arg4[%c0_8, %c0_9, %c0_10] : memref<1x8x128xf32, #tpu.memory_space<vmem>>, vector<1x8x128xf32>
      %14 = vector.shape_cast %13 : vector<1x8x128xf32> to vector<8x128xf32>
      %cst = arith.constant 1.000000e+00 : f32
      %15 = vector.broadcast %cst : f32 to vector<16x128xf32>
      %16 = arith.cmpf oeq, %6, %15 : vector<16x128xf32>
      %cst_11 = arith.constant 0.000000e+00 : f32
      %17 = vector.broadcast %cst_11 : f32 to vector<16x128xf32>
      %18 = arith.cmpf oeq, %6, %17 : vector<16x128xf32>
      %cst_12 = arith.constant 1.000000e+00 : f32
      %19 = vector.broadcast %cst_12 : f32 to vector<16x128xf32>
      %20 = arith.subf %19, %5 : vector<16x128xf32>
      %cst_13 = arith.constant 0.000000e+00 : f32
      %21 = vector.broadcast %cst_13 : f32 to vector<16x128xf32>
      %22 = arith.select %18, %20, %21 : vector<16x128xi1>, vector<16x128xf32>
      %23 = arith.select %16, %5, %22 : vector<16x128xi1>, vector<16x128xf32>
      %cst_14 = arith.constant 1.000000e-10 : f32
      %24 = vector.broadcast %cst_14 : f32 to vector<16x128xf32>
      %25 = arith.cmpf olt, %23, %24 : vector<16x128xf32>
      %cst_15 = arith.constant 1.000000e-10 : f32
      %26 = vector.broadcast %cst_15 : f32 to vector<16x128xf32>
      %27 = arith.addf %23, %26 : vector<16x128xf32>
      %28 = arith.select %25, %27, %23 : vector<16x128xi1>, vector<16x128xf32>
      %cst_16 = arith.constant 1.000000e+00 : f32
      %29 = vector.broadcast %cst_16 : f32 to vector<16x128xf32>
      %30 = arith.subf %29, %28 : vector<16x128xf32>
      %31 = arith.mulf %30, %30 : vector<16x128xf32>
      %32 = math.log %28 : vector<16x128xf32>
      %33 = arith.mulf %31, %32 : vector<16x128xf32>
      %34 = vector.shape_cast %33 : vector<16x128xf32> to vector<2x8x128xf32>
      %cst_17 = arith.constant dense<0.000000e+00> : vector<8x128xf32>
      %35 = vector.multi_reduction <add>, %34, %cst_17 [0] : vector<2x8x128xf32> to vector<8x128xf32>
      %36 = arith.addf %14, %35 : vector<8x128xf32>
      %c0_18 = arith.constant 0 : index
      %c0_19 = arith.constant 0 : index
      %c0_20 = arith.constant 0 : index
      %37 = vector.load %arg4[%c0_18, %c0_19, %c0_20] : memref<1x8x128xf32, #tpu.memory_space<vmem>>, vector<1x8x128xf32>
      %38 = vector.shape_cast %37 : vector<1x8x128xf32> to vector<8x128xf32>
      %39 = vector.shape_cast %36 : vector<8x128xf32> to vector<1x8x128xf32>
      tpu.vector_store %arg4[%c0_18, %c0_19, %c0_20], %39 {strides = array<i32>} : memref<1x8x128xf32, #tpu.memory_space<vmem>>, vector<1x8x128xf32>,
    } else {
    }
    %c0_i32_6 = arith.constant 0 : i32
    %10 = arith.cmpi eq, %1, %c0_i32_6 : i32
    %11 = arith.extui %10 : i1 to i32
    %c0_i32_7 = arith.constant 0 : i32
    %12 = arith.cmpi ne, %11, %c0_i32_7 : i32
    scf.if %12 {
      %13 = tpu.iota {dimensions = array<i32: 0>} : vector<16x128xi32>
      %c0_8 = arith.constant 0 : index
      %c0_9 = arith.constant 0 : index
      %c0_10 = arith.constant 0 : index
      %14 = vector.load %arg4[%c0_8, %c0_9, %c0_10] : memref<1x8x128xf32, #tpu.memory_space<vmem>>, vector<1x8x128xf32>
      %15 = vector.shape_cast %14 : vector<1x8x128xf32> to vector<8x128xf32>
      %c16_i32 = arith.constant 16 : i32
      %16 = vector.broadcast %c16_i32 : i32 to vector<16x128xi32>
      %17 = arith.cmpi slt, %13, %16 : vector<16x128xi32>
      %cst = arith.constant 1.000000e+00 : f32
      %18 = vector.broadcast %cst : f32 to vector<16x128xf32>
      %19 = arith.cmpf oeq, %6, %18 : vector<16x128xf32>
      %cst_11 = arith.constant 0.000000e+00 : f32
      %20 = vector.broadcast %cst_11 : f32 to vector<16x128xf32>
      %21 = arith.cmpf oeq, %6, %20 : vector<16x128xf32>
      %cst_12 = arith.constant 1.000000e+00 : f32
      %22 = vector.broadcast %cst_12 : f32 to vector<16x128xf32>
      %23 = arith.subf %22, %5 : vector<16x128xf32>
      %cst_13 = arith.constant 0.000000e+00 : f32
      %24 = vector.broadcast %cst_13 : f32 to vector<16x128xf32>
      %25 = arith.select %21, %23, %24 : vector<16x128xi1>, vector<16x128xf32>
      %26 = arith.select %19, %5, %25 : vector<16x128xi1>, vector<16x128xf32>
      %cst_14 = arith.constant 1.000000e-10 : f32
      %27 = vector.broadcast %cst_14 : f32 to vector<16x128xf32>
      %28 = arith.cmpf olt, %26, %27 : vector<16x128xf32>
      %cst_15 = arith.constant 1.000000e-10 : f32
      %29 = vector.broadcast %cst_15 : f32 to vector<16x128xf32>
      %30 = arith.addf %26, %29 : vector<16x128xf32>
      %31 = arith.select %28, %30, %26 : vector<16x128xi1>, vector<16x128xf32>
      %cst_16 = arith.constant 1.000000e+00 : f32
      %32 = vector.broadcast %cst_16 : f32 to vector<16x128xf32>
      %33 = arith.select %17, %31, %32 : vector<16x128xi1>, vector<16x128xf32>
      %cst_17 = arith.constant 1.000000e+00 : f32
      %34 = vector.broadcast %cst_17 : f32 to vector<16x128xf32>
      %35 = arith.subf %34, %33 : vector<16x128xf32>
      %36 = arith.mulf %35, %35 : vector<16x128xf32>
      %37 = math.log %33 : vector<16x128xf32>
      %38 = arith.mulf %36, %37 : vector<16x128xf32>
      %39 = vector.shape_cast %38 : vector<16x128xf32> to vector<2x8x128xf32>
      %cst_18 = arith.constant dense<0.000000e+00> : vector<8x128xf32>
      %40 = vector.multi_reduction <add>, %39, %cst_18 [0] : vector<2x8x128xf32> to vector<8x128xf32>
      %41 = arith.addf %15, %40 : vector<8x128xf32>
      %c0_19 = arith.constant 0 : index
      %c0_20 = arith.constant 0 : index
      %c0_21 = arith.constant 0 : index
      %42 = vector.load %arg4[%c0_19, %c0_20, %c0_21] : memref<1x8x128xf32, #tpu.memory_space<vmem>>, vector<1x8x128xf32>
      %43 = vector.shape_cast %42 : vector<1x8x128xf32> to vector<8x128xf32>
      %44 = vector.shape_cast %41 : vector<8x128xf32> to vector<1x8x128xf32>
      tpu.vector_store %arg4[%c0_19, %c0_20, %c0_21], %44 {strides = array<i32>} : memref<1x8x128xf32, #tpu.memory_space<vmem>>, vector<1x8x128xf32>,
    } else {
    }
    return
  }
  func.func @transform_0(%arg0: i32, %arg1: i32) -> (i32, i32) {
    %c1_i32 = arith.constant 1 : i32
    %0 = arith.muli %arg0, %c1_i32 : i32
    %1 = arith.addi %0, %arg1 : i32
    %c0_i32 = arith.constant 0 : i32
    %c0_i32_0 = arith.constant 0 : i32
    return %1, %c0_i32 : i32, i32
  }
  func.func @transform_1(%arg0: i32, %arg1: i32) -> (i32, i32) {
    %c1_i32 = arith.constant 1 : i32
    %0 = arith.muli %arg0, %c1_i32 : i32
    %1 = arith.addi %0, %arg1 : i32
    %c0_i32 = arith.constant 0 : i32
    %c0_i32_0 = arith.constant 0 : i32
    return %1, %c0_i32 : i32, i32
  }
  func.func @transform_2(%arg0: i32, %arg1: i32) -> (i32, i32, i32) {
    %c0_i32 = arith.constant 0 : i32
    %c0_i32_0 = arith.constant 0 : i32
    %c0_i32_1 = arith.constant 0 : i32
    return %arg0, %c0_i32, %c0_i32_0 : i32, i32, i32
  }
}

</mosaic_0001>

<bundles_post_ra>
// kernel: tpu_custom_call.1
= control target key start
LH: loop header
LB: loop body
LE: loop exit
PB: predicated region body
PF: predicated region fallthrough
CT: control target
= control target key end

     0   :  { %7 = vsyncpa [#allocation3], 0  ;;  %s258_s0 = inlined_call_operand.hbm [shape: f32[16,128], index: 0, kind: input, shape index: {}]   ;;  %s259_s1 = inlined_call_operand.hbm [shape: f32[16,128], index: 1, kind: input, shape index: {}]   ;;  %s260_s2 = inlined_call_operand.hbm [shape: f32[1,8,128], index: 2, kind: output, shape index: {}]  }
   0x1   :  { %8 = vsyncpa [#allocation6], 0 }
   0x2   :  { %9 = vsyncpa [#allocation4], 0  ;;  %s229_s9 = smov [#allocation2]  }
   0x3   :  { %s19_s10 = sshll.u32 %s229_s9, 4  ;;  %s20_s10 = int_to_ptr.vmem [resolvable:$true] %s19_s10 }
   0x4   :  { %s171_s11 = scalar_lea.vmem %s20_s10, 256  ;;  %p176_p1 = scmp.lt.s32.totalorder %s20_s10, %s20_s10 }
   0x5   :  { %p172_p0 = scmp.ne.s32.totalorder %s20_s10, %s171_s11  ;;  %p177_p2 = scmp.lt.s32.totalorder %s171_s11, %s171_s11 }
   0x7   :  { %p178_p3 = por %p177_p2, %p176_p1 }
   0x9   :  { %p179_p4 = pnand %p178_p3, %p172_p0 }
   0xb   :  { %182 = shalt.err (!%p179_p4)
}
   0xc   :  { %s230_s12 = smov 128   ;;  %s231_s13 = smov 8  }
   0xd   :  { %25 = dma.hbm_to_vmem [thread:$0]  %s258_s0, 256, %s20_s10, [#allocation3], %s230_s12, %s230_s12, %s231_s13  }
   0xe   :  { %s232_s16 = smov [#allocation5]  }
   0xf   :  { %s35_s17 = sshll.u32 %s232_s16, 4  ;;  %s36_s17 = int_to_ptr.vmem [resolvable:$true] %s35_s17 }
  0x10   :  { %s191_s18 = scalar_lea.vmem %s36_s17, 256  ;;  %p196_p6 = scmp.lt.s32.totalorder %s36_s17, %s36_s17 }
  0x11   :  { %p192_p5 = scmp.ne.s32.totalorder %s36_s17, %s191_s18  ;;  %p197_p7 = scmp.lt.s32.totalorder %s191_s18, %s191_s18 }
  0x13   :  { %p198_p8 = por %p197_p7, %p196_p6 }
  0x15   :  { %p199_p9 = pnand %p198_p8, %p192_p5 }
  0x17   :  { %202 = shalt.err (!%p199_p9)
}
  0x18   :  { %41 = dma.hbm_to_vmem [thread:$0]  %s259_s1, 256, %s36_s17, [#allocation6], %s230_s12, %s230_s12, %s231_s13  }
  0x19   :  { %223 = dma.done.wait [#allocation3], 256  }
  0x1a   :  { %224 = vsyncadd [#allocation3], 4294967040 }
  0x1b   :  { %225 = dma.done.wait [#allocation6], 256  }
  0x1c   :  { %226 = vsyncadd [#allocation6], 4294967040  ;;  %v58_v0 = vld [vmem:[#allocation2] sm:$0xff]  ;;  %v59_v1 = vld [vmem:[#allocation2 + $0x8] sm:$0xff]  ;;  %s233_s0 = smov [#allocation7]  }
  0x1d   :  { %v60_v2 = vld [vmem:[#allocation5] sm:$0xff]  ;;  %v61_v3 = vld [vmem:[#allocation5 + $0x8] sm:$0xff]  ;;  %v110_v4 = vsub.f32 1.0, %v58_v0  ;;  %v111_v5 = vsub.f32 1.0, %v59_v1  ;;  %s143_s1 = sshll.u32 %s233_s0, 4  ;;  %s144_s1 = int_to_ptr.vmem [resolvable:$true] %s143_s1 }
  0x1e   :  { %vm106_vm0 = vcmp.eq.f32.partialorder %v60_v2, 1.0  ;;  %vm108_vm1 = vcmp.eq.f32.partialorder %v60_v2, 0.0  ;;  %vm107_vm2 = vcmp.eq.f32.partialorder %v61_v3, 1.0  ;;  %vm109_vm3 = vcmp.eq.f32.partialorder %v61_v3, 0.0  ;;  %s203_s21 = scalar_lea.vmem %s144_s1, 128  ;;  %p208_p11 = scmp.lt.s32.totalorder %s144_s1, %s144_s1 }
  0x1f   :  { %v112_v6 = vsel %vm108_vm1, %v110_v4, 0.0  ;;  %v113_v7 = vsel %vm109_vm3, %v111_v5, 0.0  ;;  %p204_p10 = scmp.ne.s32.totalorder %s144_s1, %s203_s21  ;;  %p209_p12 = scmp.lt.s32.totalorder %s203_s21, %s203_s21 }
  0x20   :  { %v114_v8 = vsel %vm106_vm0, %v58_v0, %v112_v6  ;;  %v115_v9 = vsel %vm107_vm2, %v59_v1, %v113_v7 }
  0x21   :  { %vm116_vm4 = vcmp.lt.f32.partialorder %v114_v8, 1e-10  ;;  %vm117_vm5 = vcmp.lt.f32.partialorder %v115_v9, 1e-10  ;;  %v118_v10 = vadd.f32 1e-10, %v114_v8  ;;  %p210_p13 = por %p209_p12, %p208_p11 }
  0x22   :  { %v119_v11 = vadd.f32 1e-10, %v115_v9 }
  0x23   :  { %v120_v12 = vsel %vm116_vm4, %v118_v10, %v114_v8  ;;  %p211_p0 = pnand %p210_p13, %p204_p10 }
  0x24   :  { %v121_v13 = vsel %vm117_vm5, %v119_v11, %v115_v9  ;;  %159 = vlog2.f32 %v120_v12  ;;  %v124_v14 = vsub.f32 1.0, %v120_v12 }
  0x25   :  { %161 = vlog2.f32 %v121_v13  ;;  %v125_v15 = vsub.f32 1.0, %v121_v13 }
  0x26   :  { %v126_v16 = vmul.f32 %v124_v14, %v124_v14 }
  0x27   :  { %v127_v18 = vmul.f32 %v125_v15, %v125_v15 }
  0x31   :  { %v160_v17 = vpop.eup %159 }
  0x32   :  { %v162_v19 = vpop.eup %161  ;;  %v129_v20 = vmul.f32 0.6931472, %v160_v17 }
  0x33   :  { %v131_v21 = vmul.f32 0.6931472, %v162_v19 }
  0x34   :  { %v132_v22 = vmul.f32 %v129_v20, %v126_v16 }
  0x35   :  { %v133_v23 = vmul.f32 %v131_v21, %v127_v18 }
  0x37   :  { %v134_v24 = vadd.f32 %v133_v23, %v132_v22 }
  0x39   :  { %136 = vst [vmem:[#allocation7] sm:$0xff] %v134_v24 }
  0x3a   :  { %214 = shalt.err (!%p211_p0)
}
  0x3b   :  { %146 = dma.vmem_to_hbm [thread:$0]  %s144_s1, 128, %s260_s2, [#allocation4]  }
  0x3c   :  { %227 = dma.done.wait [#allocation4], 128  }
  0x3d   :  { %228 = vsyncadd [#allocation4], 4294967168 }
  0x3e   :  { %150 = vsyncpa [#allocation3], 1 }
  0x3f   :  { %151 = vsyncpa [#allocation6], 1 }
  0x40   :  { %152 = vsyncpa [#allocation4], 1 }

</bundles_post_ra>
